<compile_context>
chip_gen: v7x
topology: tpu7x:2x2x1
jax: 0.10.0
libtpu: 0.0.40
codegen_flags: <defaults>
</compile_context>

<pallas_src>
import jax
import jax.numpy as jnp
from jax.experimental import pallas as pl
from jax.experimental.pallas import tpu as pltpu

SENSOR_DATA_SIZE = 256                 # synthetic ObsVec.SENSOR_DATA_SIZE
D_IN = SENSOR_DATA_SIZE // 2           # 128 features into the encoder
ENCODING_SIZE = 32                     # encoder bottleneck width
BATCH = 256                            # demo batch: splits 2x128 with no padding
MAX_TILE_B = 1024                      # cap on rows per grid step


def autoencoder_kernel(x_ref, w1_ref, b1_ref, w2_ref, b2_ref, o_ref):
    """Fused encoder->relu->decoder->tanh for one batch tile.

    x_ref  : [tile_b, D_IN]  bf16  (streamed)
    w1_ref : [D_IN, E]       bf16  encoder weight, pre-transposed (resident)
    b1_ref : [1, E]          f32
    w2_ref : [E, D_IN]       bf16  decoder weight, pre-transposed (resident)
    b2_ref : [1, D_IN]       f32
    o_ref  : [tile_b, D_IN]  bf16
    """
    # Encoder: h = relu(x @ W1 + b1)  -- bf16 MXU matmul, f32 accumulation.
    h = jnp.dot(x_ref[...], w1_ref[...], preferred_element_type=jnp.float32)
    h = jnp.maximum(h + b1_ref[...], 0.0)

    # Decoder: y = tanh(h @ W2 + b2)  -- bf16 MXU matmul, f32 acc, f32 tanh (EUP).
    y = jnp.dot(h.astype(jnp.bfloat16), w2_ref[...],
                preferred_element_type=jnp.float32)
    o_ref[...] = jnp.tanh(y + b2_ref[...]).astype(o_ref.dtype)


def _round_up(v, m):
    return ((v + m - 1) // m) * m


def _choose_tiling(batch, max_tile):
    """Pick an 8-aligned batch tile and grid length.

    * tiles capped at `max_tile` rows (amortizes per-step pipeline overhead,
      stays far below VMEM limits on all generations incl. v5e's 16 MiB),
    * at least 2 — and an even number of — grid steps when the batch allows,
      so the single "parallel" axis splits evenly over v7x's two TensorCores.
    """
    n = pl.cdiv(batch, max_tile)
    if batch >= 16 and n < 2:
        n = 2
    if n > 1 and n % 2:
        n += 1
    tile = _round_up(pl.cdiv(batch, n), 8)
    grid = pl.cdiv(batch, tile)
    return tile, grid


def autoencoder_forward(x, w1, b1, w2, b2, *, max_tile=MAX_TILE_B):
    """x: [B, D_IN] bf16 -> [B, D_IN] bf16."""
    B, D = x.shape
    E = w1.shape[1]
    assert D == D_IN and w1.shape == (D, E) and w2.shape == (E, D)

    tile_b, grid_b = _choose_tiling(B, max_tile)
    b_pad = tile_b * grid_b

    padded = b_pad != B
    if padded:
        # Ragged-batch fallback only; the common path (and the demo) hits an
        # exact tiling and performs no extra HBM copies.
        x = jnp.pad(x, ((0, b_pad - B), (0, 0)))

    resident = dict(pipeline_mode=pl.Buffered(1))  # constant blocks: 1 buffer

    out = pl.pallas_call(
        autoencoder_kernel,
        out_shape=jax.ShapeDtypeStruct((b_pad, D), jnp.bfloat16),
        grid_spec=pl.GridSpec(
            grid=(grid_b,),
            in_specs=[
                pl.BlockSpec((tile_b, D), lambda i: (i, 0)),          # x (streamed)
                pl.BlockSpec((D, E), lambda i: (0, 0), **resident),   # W1
                pl.BlockSpec((1, E), lambda i: (0, 0), **resident),   # b1
                pl.BlockSpec((E, D), lambda i: (0, 0), **resident),   # W2
                pl.BlockSpec((1, D), lambda i: (0, 0), **resident),   # b2
            ],
            out_specs=pl.BlockSpec((tile_b, D), lambda i: (i, 0)),
        ),
        compiler_params=pltpu.CompilerParams(
            dimension_semantics=("parallel",)),   # shards across v7x's 2 TCs
    )(x, w1, b1, w2, b2)

    return out[:B] if padded else out


def init_params(key, d_in, enc):
    """Deterministic init mimicking nn.Linear's U(-1/sqrt(fan_in), +1/sqrt(fan_in)).

    Weights are stored pre-transposed ([in, out]) in bf16; biases stay f32
    (added post-accumulation in f32 inside the kernel).
    """
    k1, k2, k3, k4 = jax.random.split(key, 4)
    bound1 = 1.0 / jnp.sqrt(d_in)
    bound2 = 1.0 / jnp.sqrt(enc)
    w1 = jax.random.uniform(k1, (d_in, enc), jnp.float32, -bound1, bound1)
    b1 = jax.random.uniform(k2, (1, enc), jnp.float32, -bound1, bound1)
    w2 = jax.random.uniform(k3, (enc, d_in), jnp.float32, -bound2, bound2)
    b2 = jax.random.uniform(k4, (1, d_in), jnp.float32, -bound2, bound2)
    return w1.astype(jnp.bfloat16), b1, w2.astype(jnp.bfloat16), b2


def reference_forward(x, w1, b1, w2, b2):
    """Pure-JAX f32 reference (on the same bf16-rounded inputs/weights)."""
    x32 = x.astype(jnp.float32)
    w1_32 = w1.astype(jnp.float32)
    w2_32 = w2.astype(jnp.float32)
    h = jax.nn.relu(x32 @ w1_32 + b1)
    return jnp.tanh(h @ w2_32 + b2)


if __name__ == "__main__":
    key = jax.random.PRNGKey(0)
    kx, kp = jax.random.split(key)

    x = jax.random.normal(kx, (BATCH, D_IN), jnp.float32).astype(jnp.bfloat16)
    w1, b1, w2, b2 = init_params(kp, D_IN, ENCODING_SIZE)

    out = autoencoder_forward(x, w1, b1, w2, b2)
    out = jax.block_until_ready(out)

    ref = reference_forward(x, w1, b1, w2, b2)
    assert out.shape == (BATCH, D_IN)
    assert jnp.allclose(out.astype(jnp.float32), ref, atol=2e-2, rtol=0.0), \
        "mismatch vs reference"

    print("KERNEL_OK")
</pallas_src>

<mosaic_0001>
module attributes {stable_mosaic.version = 11 : i64} {
  func.func @autoencoder_kernel(%arg0: i32, %arg1: memref<128x128xbf16, #tpu.memory_space<vmem>>, %arg2: memref<128x32xbf16, #tpu.memory_space<vmem>>, %arg3: memref<1x32xf32, #tpu.memory_space<vmem>>, %arg4: memref<32x128xbf16, #tpu.memory_space<vmem>>, %arg5: memref<1x128xf32, #tpu.memory_space<vmem>>, %arg6: memref<128x128xbf16, #tpu.memory_space<vmem>>) attributes {dimension_semantics = [#tpu.dimension_semantics<parallel>], iteration_bounds = array<i64: 2>, scalar_prefetch = 0 : i64, scratch_operands = 0 : i64, tpu.core_type = #tpu.core_type<tc>, window_params = [{transform_indices = @transform_0, window_bounds = array<i64: 128, 128>}, {pipeline_mode = #tpu.pipeline_mode<synchronous>, transform_indices = @transform_1, window_bounds = array<i64: 128, 32>}, {pipeline_mode = #tpu.pipeline_mode<synchronous>, transform_indices = @transform_2, window_bounds = array<i64: 1, 32>}, {pipeline_mode = #tpu.pipeline_mode<synchronous>, transform_indices = @transform_3, window_bounds = array<i64: 32, 128>}, {pipeline_mode = #tpu.pipeline_mode<synchronous>, transform_indices = @transform_4, window_bounds = array<i64: 1, 128>}, {transform_indices = @transform_5, window_bounds = array<i64: 128, 128>}]} {
    %c0 = arith.constant 0 : index
    %c0_0 = arith.constant 0 : index
    %0 = vector.load %arg1[%c0, %c0_0] : memref<128x128xbf16, #tpu.memory_space<vmem>>, vector<128x128xbf16>
    %c0_1 = arith.constant 0 : index
    %c0_2 = arith.constant 0 : index
    %1 = vector.load %arg2[%c0_1, %c0_2] : memref<128x32xbf16, #tpu.memory_space<vmem>>, vector<128x32xbf16>
    %cst = arith.constant dense<0.000000e+00> : vector<128x32xf32>
    %2 = tpu.matmul %0, %1, %cst {dimension_numbers = #tpu.dot_dimension_numbers<[1], [0], [0], [1], [0, 0, 1, 1], [], []>} : vector<128x128xbf16>, vector<128x32xbf16>, vector<128x32xf32> -> vector<128x32xf32>
    %c0_3 = arith.constant 0 : index
    %c0_4 = arith.constant 0 : index
    %3 = vector.load %arg3[%c0_3, %c0_4] : memref<1x32xf32, #tpu.memory_space<vmem>>, vector<1x32xf32>
    %4 = vector.broadcast %3 : vector<1x32xf32> to vector<128x32xf32>
    %5 = arith.addf %2, %4 : vector<128x32xf32>
    %cst_5 = arith.constant 0.000000e+00 : f32
    %6 = vector.broadcast %cst_5 : f32 to vector<128x32xf32>
    %7 = arith.maximumf %5, %6 : vector<128x32xf32>
    %8 = arith.truncf %7 : vector<128x32xf32> to vector<128x32xbf16>
    %c0_6 = arith.constant 0 : index
    %c0_7 = arith.constant 0 : index
    %9 = vector.load %arg4[%c0_6, %c0_7] : memref<32x128xbf16, #tpu.memory_space<vmem>>, vector<32x128xbf16>
    %cst_8 = arith.constant dense<0.000000e+00> : vector<128x128xf32>
    %10 = tpu.matmul %8, %9, %cst_8 {dimension_numbers = #tpu.dot_dimension_numbers<[1], [0], [0], [1], [0, 0, 1, 1], [], []>} : vector<128x32xbf16>, vector<32x128xbf16>, vector<128x128xf32> -> vector<128x128xf32>
    %c0_9 = arith.constant 0 : index
    %c0_10 = arith.constant 0 : index
    %11 = vector.load %arg5[%c0_9, %c0_10] : memref<1x128xf32, #tpu.memory_space<vmem>>, vector<1x128xf32>
    %12 = vector.broadcast %11 : vector<1x128xf32> to vector<128x128xf32>
    %13 = arith.addf %10, %12 : vector<128x128xf32>
    %14 = math.tanh %13 : vector<128x128xf32>
    %15 = arith.truncf %14 : vector<128x128xf32> to vector<128x128xbf16>
    %c0_11 = arith.constant 0 : index
    %c0_12 = arith.constant 0 : index
    %16 = vector.load %arg6[%c0_11, %c0_12] : memref<128x128xbf16, #tpu.memory_space<vmem>>, vector<128x128xbf16>
    tpu.vector_store %arg6[%c0_11, %c0_12], %15 {strides = array<i32>} : memref<128x128xbf16, #tpu.memory_space<vmem>>, vector<128x128xbf16>,
    return
  }
  func.func @transform_0(%arg0: i32) -> (i32, i32) {
    %c0_i32 = arith.constant 0 : i32
    %c0_i32_0 = arith.constant 0 : i32
    return %arg0, %c0_i32 : i32, i32
  }
  func.func @transform_1(%arg0: i32) -> (i32, i32) {
    %c0_i32 = arith.constant 0 : i32
    %c0_i32_0 = arith.constant 0 : i32
    %c0_i32_1 = arith.constant 0 : i32
    return %c0_i32, %c0_i32_0 : i32, i32
  }
  func.func @transform_2(%arg0: i32) -> (i32, i32) {
    %c0_i32 = arith.constant 0 : i32
    %c0_i32_0 = arith.constant 0 : i32
    %c0_i32_1 = arith.constant 0 : i32
    return %c0_i32, %c0_i32_0 : i32, i32
  }
  func.func @transform_3(%arg0: i32) -> (i32, i32) {
    %c0_i32 = arith.constant 0 : i32
    %c0_i32_0 = arith.constant 0 : i32
    %c0_i32_1 = arith.constant 0 : i32
    return %c0_i32, %c0_i32_0 : i32, i32
  }
  func.func @transform_4(%arg0: i32) -> (i32, i32) {
    %c0_i32 = arith.constant 0 : i32
    %c0_i32_0 = arith.constant 0 : i32
    %c0_i32_1 = arith.constant 0 : i32
    return %c0_i32, %c0_i32_0 : i32, i32
  }
  func.func @transform_5(%arg0: i32) -> (i32, i32) {
    %c0_i32 = arith.constant 0 : i32
    %c0_i32_0 = arith.constant 0 : i32
    return %arg0, %c0_i32 : i32, i32
  }
}

</mosaic_0001>

<bundles_post_ra>
// kernel: tpu_custom_call.1
= control target key start
LH: loop header
LB: loop body
LE: loop exit
PB: predicated region body
PF: predicated region fallthrough
CT: control target
= control target key end

     0   :  { %10 = vsyncpa [#allocation3], 0  ;;  %s1514_s0 = inlined_call_operand.hbm [shape: bf16[256,128], index: 0, kind: input, shape index: {}]   ;;  %s1515_s1 = inlined_call_operand.vmem [shape: bf16[128,32], index: 1, kind: input, shape index: {}]   ;;  %s1516_s2 = inlined_call_operand.vmem [shape: f32[1,32], index: 2, kind: input, shape index: {}]   ;;  %s1517_s3 = inlined_call_operand.vmem [shape: bf16[32,128], index: 3, kind: input, shape index: {}]   ;;  %s1518_s4 = inlined_call_operand.vmem [shape: f32[1,128], index: 4, kind: input, shape index: {}]   ;;  %s1519_s5 = inlined_call_operand.hbm [shape: bf16[256,128], index: 5, kind: output, shape index: {}]  }
   0x1   :  { %12 = vsyncpa [#allocation3 + $0x1], 0 }
   0x2   :  { %13 = vsyncpa [#allocation4], 0 }
   0x3   :  { %15 = vsyncpa [#allocation4 + $0x1], 0  ;;  %s1265_s18 = smov 0   ;;  %s1267_s19 = smov 0  }
   0x4   :  { %s1269_s20 = smov 0   ;;  %s1271_s21 = smov 0  }
   0x5 LB: > { %s1286_s22 = sadd.s32 4294967295, %s1227_s21   ;;  %s830_s23 = sadd.s32 4294967294, %s1227_s21   ;;  %s1227_s21 = sphi %s1271_s21, %s1532_s21   ;;  %s1223_s20 = sphi %s1269_s20, %s1531_s20   ;;  %s1219_s19 = sphi %s1267_s19, %s1530_s19   ;;  %s1215_s18 = sphi %s1265_s18, %s1529_s18  }
   0x6   : > { %s1290_s24 = sadd.s32 1, %s1227_s21   ;;  %s28_s25 = sadd.s32 1, %s1223_s20 }
   0x7   : > { %s25_s26 = ssub.s32 %s1227_s21, %s1290_s24  ;;  %p35_p0 = scmp.ne.s32.totalorder %s1223_s20, %s1219_s19 }
   0x8   : > { %p26_p1 = scmp.eq.s32.totalorder %s25_s26, 0  ;;  %p36_p2 = scmp.eq.s32.totalorder %s1227_s21, 0 }
   0x9   : > { %p41_p3 = scmp.ne.s32.totalorder %s1219_s19, %s1215_s18  ;;  %p42_p4 = scmp.eq.s32.totalorder %s1286_s22, 0 }
   0xa   : > { %s1302_s27 = scalar_select %p26_p1, %s1223_s20, %s28_s25  }
   0xb   : > { %p1304_p5 = por %p36_p2, %p35_p0  ;;  %p1308_p6 = por %p42_p4, %p41_p3 }
   0xc   : > { %p149_p7 = scmp.eq.s32.totalorder %s1286_s22, 1  ;;  %p155_p8 = scmp.eq.s32.totalorder %s830_s23, 1 }
   0xd   : > { %p1043_p10 = scmp.lt.s32.totalorder %s1227_s21, 2  ;;  %s187_s7 = sand.u32 1, %s1223_s20  }
   0xe   : > { %p1315_p11 = por %p149_p7, %p35_p0  ;;  %p1319_p12 = por %p155_p8, %p41_p3 }
   0xf   : > { %s888_s8 = sshll.u32 %s1227_s21, 10  ;;  %s833_s9 = sshll.u32 %s187_s7, 6 }
  0x10   : > { %s1523_s30 = scalar_select %p1315_p11, 1, 0 }
  0x11   : > { %s1524_s6 = scalar_select %p1319_p12, 1, 0 }
  0x12   : > { %s1328_s12 = scalar_lea.hbm %s1514_s0, %s888_s8  ;;  %s191_s13 = scalar_lea.vmem [#allocation2], %s833_s9 }
  0x13   : > { %s198_s14 = sshll.u32 %s191_s13, 4  ;;  %p1332_p13 = pnand %p1043_p10, %p1304_p5  ;;  %s1336_s14 = int_to_ptr.vmem [resolvable:$true] %s198_s14 }
  0x14   : > { %s1338_s16 = scalar_lea.sflag [#allocation3], %s187_s7  ;;  %s1131_s17 = scalar_lea.hbm %s1328_s12, 1024 }
  0x15   : > { %p1132_p0 = scmp.ne.s32.totalorder %s1328_s12, %s1131_s17  ;;  %p1133_p1 = pneg %p1332_p13 }
  0x16   : > { %s1136_s26 = scalar_lea.hbm %s1514_s0, 2048  ;;  %p1137_p4 = scmp.lt.u32.totalorder %s1328_s12, %s1514_s0 }
  0x17   : > { %p1134_p2 = pnand %p1133_p1, %p1132_p0  ;;  %p1138_p5 = scmp.lt.u32.totalorder %s1136_s26, %s1131_s17 }
  0x18   : > { %p1140_p8 = scmp.lt.u32.totalorder %s1131_s17, %s1328_s12 }
  0x19   : > { %p1135_p3 = pneg %p1134_p2  ;;  %p1139_p7 = por %p1138_p5, %p1137_p4 }
  0x1b   : > { %p1141_p10 = por %p1140_p8, %p1139_p7 }
  0x1d   : > { %p1142_p9 = pnand %p1141_p10, %p1135_p3 }
  0x1f   : > { %1145 = shalt.err (!%p1142_p9)
}
  0x20   : > { %s1146_s7 = scalar_lea.vmem %s1336_s14, 1024  ;;  %s1229_s9 = smov [#allocation2]  }
  0x21   : > { %p1147_p0 = scmp.ne.s32.totalorder %s1336_s14, %s1146_s7  ;;  %s1151_s10 = sshll.u32 %s1229_s9, 4  ;;  %s1152_s10 = int_to_ptr.vmem [resolvable:$false] %s1151_s10 }
  0x22   : > { %s1153_s11 = scalar_lea.vmem %s1152_s10, 2048  ;;  %p1154_p11 = scmp.lt.s32.totalorder %s1336_s14, %s1152_s10 }
  0x23   : > { %p1149_p2 = pnand %p1147_p0, %p1133_p1  ;;  %p1155_p4 = scmp.lt.s32.totalorder %s1153_s11, %s1146_s7 }
  0x25   : > { %p1150_p12 = pneg %p1149_p2  ;;  %p1156_p5 = por %p1155_p4, %p1154_p11 }
  0x27   : > { %p1157_p7 = pnand %p1156_p5, %p1150_p12 }
  0x29   : > { %1160 = shalt.err (!%p1157_p7)
}
  0x2a   : > { %s1230_s13 = smov 64   ;;  %s1231_s17 = smov 4  }
  0x2b   : > { %1038 = dma.hbm_to_vmem [thread:$0]  (!%p1332_p13), %s1328_s12, 1024, %s1336_s14, %s1338_s16, %s1230_s13, %s1230_s13, %s1231_s17  }
  0x2c   : > { %p836_p9 = scmp.ge.s32.totalorder %s1227_s21, 1  ;;  %p206_p1 = scmp.lt.s32.totalorder %s1227_s21, 3 }
  0x2e   : > { %p207_p3 = pnand %p836_p9, %p206_p1 }
  0x2f   : > { %s1369_s23 = sand.u32 (!%p207_p3), 1, %s1219_s19  }
  0x30   : > { %210 = sbr.rel (%p207_p3) target bundleno = 580 (0x244), region = 40  ;;  %s837_s25 = sshll.u32 (!%p207_p3), %s1369_s23, 6 }
  0x31   : > { %s213_s26 = scalar_lea.sflag (!%p207_p3), [#allocation3], %s1369_s23  ;;  %s1375_s28 = scalar_lea.vmem (!%p207_p3), [#allocation2], %s837_s25 }
  0x37   : > { %1206 = dma.done.wait (%p1308_p6), %s213_s26, 1024  }
  0x38   : > { %1208 = vsyncadd (%p1308_p6), %s213_s26, 4294966272  ;;  %v1081_v0 = vld [vmem:[%s1515_s1] sm:$0xff]   ;;  %v1082_v1 = vld [vmem:[%s1515_s1 + $0x8] sm:$0xff]   ;;  %vm525_vm0 = vcmask 261120   ;;  %s1446_s13 = scalar_lea.vmem [#allocation5], %s837_s25  ;;  %s905_s25 = sshll.u32 %s1286_s22, 10 }
  0x39   : > { %979 = vmatprep.subr.bf16.mxu0 %v1081_v0  ;;  %v1083_v2 = vld [vmem:[%s1515_s1 + $0x10] sm:$0xff]   ;;  %v1084_v3 = vld [vmem:[%s1515_s1 + $0x18] sm:$0xff]   ;;  %v1089_v4 = vld [vmem:[%s1375_s28] sm:$0xff]   ;;  %s757_s17 = sshll.u32 %s1446_s13, 4  ;;  %s1466_s14 = scalar_lea.hbm %s1519_s5, %s905_s25  ;;  %s1468_s17 = int_to_ptr.vmem [resolvable:$true] %s757_s17 }
  0x3a   : > { %980 = vmatpush3.bf16.msra.mxu0 %v1081_v0  ;;  %995 = vmatprep.mubr.bf16.mxu0 %v1089_v4  ;;  %v1085_v5 = vld [vmem:[%s1515_s1 + $0x20] sm:$0xff]   ;;  %v1086_v6 = vld [vmem:[%s1515_s1 + $0x28] sm:$0xff]   ;;  %v1087_v7 = vld [vmem:[%s1515_s1 + $0x30] sm:$0xff]   ;;  %s744_s15 = scalar_lea.sflag [#allocation4], %s1369_s23  ;;  %s1161_s22 = scalar_lea.vmem %s1468_s17, 1024 }
  0x3b   : > { %981 = vmatprep.subr.bf16.mxu0 %v1082_v1  ;;  %v1088_v8 = vld [vmem:[%s1515_s1 + $0x38] sm:$0xff]   ;;  %v1090_v9 = vld [vmem:[%s1375_s28 + $0x8] sm:$0xff]   ;;  %v1091_v10 = vld [vmem:[%s1375_s28 + $0x10] sm:$0xff]   ;;  %p1162_p6 = scmp.ne.s32.totalorder %s1468_s17, %s1161_s22  ;;  %p1526_p11 = scmp.ne.s32.totalorder %s1523_s30, 0 }
  0x3c   : > { %v1092_v11 = vld [vmem:[%s1375_s28 + $0x18] sm:$0xff]   ;;  %v1093_v12 = vld [vmem:[%s1375_s28 + $0x20] sm:$0xff]   ;;  %v1094_v13 = vld [vmem:[%s1375_s28 + $0x28] sm:$0xff]   ;;  %s1232_s16 = smov [#allocation5]  }
  0x3d   : > { %v1095_v14 = vld [vmem:[%s1375_s28 + $0x30] sm:$0xff]   ;;  %v1096_v15 = vld [vmem:[%s1375_s28 + $0x38] sm:$0xff]   ;;  %v1097_v16 = vld [vmem:[%s1517_s3] sm:$0xff]   ;;  %p1163_p12 = pnand %p1162_p6, %p1526_p11  ;;  %s1165_s8 = sshll.u32 %s1232_s16, 4  ;;  %s1166_s8 = int_to_ptr.vmem [resolvable:$false] %s1165_s8 }
  0x3e   : > { %982 = vmatpush3.bf16.msra.mxu0 %v1082_v1  ;;  %1011 = vmatprep.subr.bf16.mxu1 %v1097_v16  ;;  %v1098_v17 = vld [vmem:[%s1517_s3 + $0x8] sm:$0xff]   ;;  %v839_v18 = vld [vmem:[%s1516_s2] ss:$0 sm:$0xff]  ;;  %s1167_s7 = scalar_lea.vmem %s1166_s8, 2048  ;;  %p1168_p8 = scmp.lt.s32.totalorder %s1468_s17, %s1166_s8 }
  0x3f   : > { %983 = vmatprep.subr.bf16.mxu0 %v1083_v2  ;;  %1012 = vmatpush3.bf16.msra.mxu1 %v1097_v16  ;;  %p1164_p13 = pneg %p1163_p12  ;;  %p1169_p10 = scmp.lt.s32.totalorder %s1167_s7, %s1161_s22 }
  0x40   : > { %1013 = vmatprep.subr.bf16.mxu1 %v1098_v17 }
  0x41   : > { %p1170_p0 = por %p1169_p10, %p1168_p8 }
  0x42   : > { %984 = vmatpush3.bf16.msra.mxu0 %v1083_v2 }
  0x43   : > { %985 = vmatprep.subr.bf16.mxu0 %v1084_v3  ;;  %1014 = vmatpush3.bf16.msra.mxu1 %v1098_v17  ;;  %p1171_p2 = pnand %p1170_p0, %p1164_p13 }
  0x46   : > { %986 = vmatpush3.bf16.msra.mxu0 %v1084_v3 }
  0x47   : > { %987 = vmatprep.subr.bf16.mxu0 %v1085_v5 }
  0x4a   : > { %988 = vmatpush3.bf16.msra.mxu0 %v1085_v5 }
  0x4b   : > { %989 = vmatprep.subr.bf16.mxu0 %v1086_v6 }
  0x4e   : > { %990 = vmatpush3.bf16.msra.mxu0 %v1086_v6 }
  0x4f   : > { %991 = vmatprep.subr.bf16.mxu0 %v1087_v7 }
  0x52   : > { %992 = vmatpush3.bf16.msra.mxu0 %v1087_v7 }
  0x53   : > { %993 = vmatprep.subr.bf16.mxu0 %v1088_v8 }
  0x56   : > { %994 = vmatpush3.bf16.msra.mxu0 %v1088_v8 }
  0x59   : > { %996 = vmatmul.mubr.bf16.vlgmr.msra.gmra.mrb[0].mxu0 %v1090_v9 }
  0x5a   : > { %999 = vmatprep.mubr.bf16.mxu0 %v1091_v10 }
  0x61   : > { %1000 = vmatmul.mubr.bf16.gmra.mrb[4].mxu0 %v1092_v11  ;;  %v1433_v11 = vld [vmem:[%s1518_s4] ss:$0 sm:$0xff] }
  0x62   : > { %1003 = vmatprep.mubr.bf16.mxu0 %v1093_v12 }
  0x69   : > { %1004 = vmatmul.mubr.bf16.gmra.mrb[8].mxu0 %v1094_v13 }
  0x6a   : > { %1007 = vmatprep.mubr.bf16.mxu0 %v1095_v14 }
  0x71   : > { %1008 = vmatmul.mubr.bf16.gmra.mrb[12].mxu0 %v1096_v15 }
 0x12c   : > { %v997_v19 = vpop.f32.mrb[0].mxu0 }
 0x12d   : > { %v424_v20 = vadd.f32 %v997_v19, %v839_v18  ;;  %v415_v21 = vpop.f32.mrb[1].mxu0 }
 0x12e   : > { %v416_v22 = vadd.f32 %v839_v18, %v415_v21  ;;  %v998_v23 = vpop.f32.mrb[2].mxu0 }
 0x12f   : > { %v427_v24 = vadd.f32 %v998_v23, %v839_v18  ;;  %v418_v25 = vpop.f32.mrb[3].mxu0  ;;  %v480_v27 = vmax.f32 %v424_v20, 0.0 }
 0x130   : > { %v419_v26 = vadd.f32 %v839_v18, %v418_v25  ;;  %v478_v29 = vmax.f32 %v416_v22, 0.0 }
 0x131   : > { %v481_v28 = vmax.f32 %v427_v24, 0.0 }
 0x132   : > { %v479_v30 = vmax.f32 %v419_v26, 0.0 }
 0x133   : > { %v495_v31 = vpack.c.bf16 %v481_v28, %v480_v27 }
 0x134   : > { %v1001_v32 = vpop.f32.mrb[4].mxu0  ;;  %v494_v33 = vpack.c.bf16 %v479_v30, %v478_v29 }
 0x135   : > { %v440_v34 = vadd.f32 %v1001_v32, %v839_v18  ;;  %v431_v35 = vpop.f32.mrb[5].mxu0 }
 0x136   : > { %v432_v36 = vadd.f32 %v839_v18, %v431_v35  ;;  %v1002_v37 = vpop.f32.mrb[6].mxu0  ;;  %1015 = vmatprep.mubr.msk.bf16.mxu1 %vm525_vm0, %v494_v33 }
 0x137   : > { %v443_v38 = vadd.f32 %v1002_v37, %v839_v18  ;;  %v434_v39 = vpop.f32.mrb[7].mxu0  ;;  %1016 = vmatmul.mubr.msk.bf16.vlgmr.msra.gmra.mrb[0].mxu1 %vm525_vm0, %v495_v31  ;;  %v484_v41 = vmax.f32 %v440_v34, 0.0 }
 0x138   : > { %v435_v40 = vadd.f32 %v839_v18, %v434_v39  ;;  %v482_v43 = vmax.f32 %v432_v36, 0.0 }
 0x139   : > { %v485_v42 = vmax.f32 %v443_v38, 0.0 }
 0x13a   : > { %v483_v44 = vmax.f32 %v435_v40, 0.0 }
 0x13b   : > { %v497_v45 = vpack.c.bf16 %v485_v42, %v484_v41 }
 0x13c   : > { %v496_v46 = vpack.c.bf16 %v483_v44, %v482_v43  ;;  %v1005_v47 = vpop.f32.mrb[8].mxu0 }
 0x13d   : > { %v456_v48 = vadd.f32 %v1005_v47, %v839_v18  ;;  %v447_v49 = vpop.f32.mrb[9].mxu0 }
 0x13e   : > { %v448_v50 = vadd.f32 %v839_v18, %v447_v49  ;;  %v1006_v51 = vpop.f32.mrb[10].mxu0  ;;  %1019 = vmatprep.mubr.msk.bf16.mxu1 %vm525_vm0, %v496_v46 }
 0x13f   : > { %v459_v52 = vadd.f32 %v1006_v51, %v839_v18  ;;  %v450_v53 = vpop.f32.mrb[11].mxu0  ;;  %1020 = vmatmul.mubr.msk.bf16.gmra.mrb[4].mxu1 %vm525_vm0, %v497_v45  ;;  %v488_v55 = vmax.f32 %v456_v48, 0.0 }
 0x140   : > { %v451_v54 = vadd.f32 %v839_v18, %v450_v53  ;;  %v486_v57 = vmax.f32 %v448_v50, 0.0 }
 0x141   : > { %v489_v56 = vmax.f32 %v459_v52, 0.0 }
 0x142   : > { %v487_v58 = vmax.f32 %v451_v54, 0.0 }
 0x143   : > { %v499_v59 = vpack.c.bf16 %v489_v56, %v488_v55 }
 0x144   : > { %v498_v60 = vpack.c.bf16 %v487_v58, %v486_v57  ;;  %v1009_v61 = vpop.f32.mrb[12].mxu0 }
 0x145   : > { %v472_v62 = vadd.f32 %v1009_v61, %v839_v18  ;;  %v463_v63 = vpop.f32.mrb[13].mxu0 }
 0x146   : > { %v464_v0 = vadd.f32 %v839_v18, %v463_v63  ;;  %v1010_v1 = vpop.f32.mrb[14].mxu0  ;;  %1023 = vmatprep.mubr.msk.bf16.mxu1 %vm525_vm0, %v498_v60 }
 0x147   : > { %v475_v2 = vadd.f32 %v1010_v1, %v839_v18  ;;  %v466_v3 = vpop.f32.mrb[15].mxu0  ;;  %1024 = vmatmul.mubr.msk.bf16.gmra.mrb[8].mxu1 %vm525_vm0, %v499_v59  ;;  %v492_v5 = vmax.f32 %v472_v62, 0.0 }
 0x148   : > { %v467_v4 = vadd.f32 %v839_v18, %v466_v3  ;;  %v490_v7 = vmax.f32 %v464_v0, 0.0 }
 0x149   : > { %v493_v6 = vmax.f32 %v475_v2, 0.0 }
 0x14a   : > { %v491_v8 = vmax.f32 %v467_v4, 0.0 }
 0x14b   : > { %v501_v9 = vpack.c.bf16 %v493_v6, %v492_v5 }
 0x14c   : > { %v500_v10 = vpack.c.bf16 %v491_v8, %v490_v7 }
 0x14e   : > { %1027 = vmatprep.mubr.msk.bf16.mxu1 %vm525_vm0, %v500_v10 }
 0x14f   : > { %1028 = vmatmul.mubr.msk.bf16.gmra.mrb[12].mxu1 %vm525_vm0, %v501_v9 }
 0x20a   : > { %v1017_v12 = vpop.f32.mrb[0].mxu1 }
 0x20b   : > { %v593_v13 = vadd.f32 %v1017_v12, %v1433_v11  ;;  %v584_v14 = vpop.f32.mrb[1].mxu1 }
 0x20c   : > { %v585_v15 = vadd.f32 %v1433_v11, %v584_v14  ;;  %v1018_v16 = vpop.f32.mrb[2].mxu1 }
 0x20d   : > { %1099 = vtanh.f32 %v593_v13  ;;  %v596_v17 = vadd.f32 %v1018_v16, %v1433_v11  ;;  %v587_v18 = vpop.f32.mrb[3].mxu1 }
 0x20e   : > { %1101 = vtanh.f32 %v585_v15  ;;  %v588_v19 = vadd.f32 %v1433_v11, %v587_v18 }
 0x20f   : > { %1103 = vtanh.f32 %v596_v17 }
 0x210   : > { %1105 = vtanh.f32 %v588_v19 }
 0x212   : > { %v1021_v20 = vpop.f32.mrb[4].mxu1 }
 0x213   : > { %v609_v21 = vadd.f32 %v1021_v20, %v1433_v11  ;;  %v600_v22 = vpop.f32.mrb[5].mxu1 }
 0x214   : > { %v601_v23 = vadd.f32 %v1433_v11, %v600_v22  ;;  %v1022_v24 = vpop.f32.mrb[6].mxu1 }
 0x215   : > { %1107 = vtanh.f32 %v609_v21  ;;  %v612_v25 = vadd.f32 %v1022_v24, %v1433_v11  ;;  %v603_v26 = vpop.f32.mrb[7].mxu1 }
 0x216   : > { %1109 = vtanh.f32 %v601_v23  ;;  %v604_v27 = vadd.f32 %v1433_v11, %v603_v26 }
 0x217   : > { %v1100_v28 = vpop.eup %1099  ;;  %1111 = vtanh.f32 %v612_v25 }
 0x218   : > { %v1102_v29 = vpop.eup %1101  ;;  %1113 = vtanh.f32 %v604_v27 }
 0x219   : > { %v1104_v30 = vpop.eup %1103 }
 0x21a   : > { %v1106_v31 = vpop.eup %1105  ;;  %v914_v32 = vpack.c.bf16 %v1104_v30, %v1100_v28  ;;  %v1025_v33 = vpop.f32.mrb[8].mxu1 }
 0x21b   : > { %v909_v34 = vpack.c.bf16 %v1106_v31, %v1102_v29  ;;  %v625_v35 = vadd.f32 %v1025_v33, %v1433_v11  ;;  %v616_v36 = vpop.f32.mrb[9].mxu1 }
 0x21c   : > { %946 = vst [vmem:[%s1446_s13 + $0x8] sm:$0xff] %v914_v32   ;;  %v617_v37 = vadd.f32 %v1433_v11, %v616_v36  ;;  %v1026_v38 = vpop.f32.mrb[10].mxu1 }
 0x21d   : > { %910 = vst [vmem:[%s1446_s13] sm:$0xff] %v909_v34   ;;  %1115 = vtanh.f32 %v625_v35  ;;  %v628_v39 = vadd.f32 %v1026_v38, %v1433_v11  ;;  %v619_v40 = vpop.f32.mrb[11].mxu1 }
 0x21e   : > { %1117 = vtanh.f32 %v617_v37  ;;  %v620_v41 = vadd.f32 %v1433_v11, %v619_v40 }
 0x21f   : > { %v1108_v42 = vpop.eup %1107  ;;  %1119 = vtanh.f32 %v628_v39 }
 0x220   : > { %v1110_v43 = vpop.eup %1109  ;;  %1121 = vtanh.f32 %v620_v41 }
 0x221   : > { %v1112_v44 = vpop.eup %1111 }
 0x222   : > { %v1114_v45 = vpop.eup %1113  ;;  %v924_v46 = vpack.c.bf16 %v1112_v44, %v1108_v42  ;;  %v1029_v47 = vpop.f32.mrb[12].mxu1 }
 0x223   : > { %v919_v48 = vpack.c.bf16 %v1114_v45, %v1110_v43  ;;  %v641_v49 = vadd.f32 %v1029_v47, %v1433_v11  ;;  %v632_v50 = vpop.f32.mrb[13].mxu1 }
 0x224   : > { %948 = vst [vmem:[%s1446_s13 + $0x18] sm:$0xff] %v924_v46   ;;  %v633_v51 = vadd.f32 %v1433_v11, %v632_v50  ;;  %v1030_v52 = vpop.f32.mrb[14].mxu1 }
 0x225   : > { %947 = vst [vmem:[%s1446_s13 + $0x10] sm:$0xff] %v919_v48   ;;  %1123 = vtanh.f32 %v641_v49  ;;  %v644_v53 = vadd.f32 %v1030_v52, %v1433_v11  ;;  %v635_v54 = vpop.f32.mrb[15].mxu1 }
 0x226   : > { %1125 = vtanh.f32 %v633_v51  ;;  %v636_v55 = vadd.f32 %v1433_v11, %v635_v54 }
 0x227   : > { %v1116_v56 = vpop.eup %1115  ;;  %1127 = vtanh.f32 %v644_v53 }
 0x228   : > { %v1118_v57 = vpop.eup %1117  ;;  %1129 = vtanh.f32 %v636_v55 }
 0x229   : > { %v1120_v58 = vpop.eup %1119 }
 0x22a   : > { %v1122_v59 = vpop.eup %1121  ;;  %v934_v60 = vpack.c.bf16 %v1120_v58, %v1116_v56 }
 0x22b   : > { %v929_v61 = vpack.c.bf16 %v1122_v59, %v1118_v57 }
 0x22c   : > { %950 = vst [vmem:[%s1446_s13 + $0x28] sm:$0xff] %v934_v60  }
 0x22d   : > { %949 = vst [vmem:[%s1446_s13 + $0x20] sm:$0xff] %v929_v61  }
 0x22f   : > { %v1124_v62 = vpop.eup %1123 }
 0x230   : > { %v1126_v63 = vpop.eup %1125 }
 0x231   : > { %v1128_v0 = vpop.eup %1127 }
 0x232   : > { %v1130_v1 = vpop.eup %1129  ;;  %v944_v2 = vpack.c.bf16 %v1128_v0, %v1124_v62 }
 0x233   : > { %v939_v3 = vpack.c.bf16 %v1130_v1, %v1126_v63 }
 0x234   : > { %952 = vst [vmem:[%s1446_s13 + $0x38] sm:$0xff] %v944_v2  }
 0x235   : > { %951 = vst [vmem:[%s1446_s13 + $0x30] sm:$0xff] %v939_v3  }
 0x236   : > { %1174 = shalt.err (!%p1171_p2)
}
 0x237   : > { %s1175_s9 = scalar_lea.hbm %s1466_s14, 1024  ;;  %s1179_s28 = scalar_lea.hbm %s1519_s5, 2048 }
 0x238   : > { %p1176_p4 = scmp.ne.s32.totalorder %s1466_s14, %s1175_s9  ;;  %p1180_p9 = scmp.lt.u32.totalorder %s1466_s14, %s1519_s5 }
 0x239   : > { %p1181_p1 = scmp.lt.u32.totalorder %s1179_s28, %s1175_s9  ;;  %p1183_p6 = scmp.lt.u32.totalorder %s1175_s9, %s1466_s14 }
 0x23a   : > { %p1177_p5 = pnand %p1176_p4, %p1526_p11 }
 0x23b   : > { %p1182_p3 = por %p1181_p1, %p1180_p9 }
 0x23c   : > { %p1178_p7 = pneg %p1177_p5 }
 0x23d   : > { %p1184_p12 = por %p1183_p6, %p1182_p3 }
 0x23f   : > { %p1185_p13 = pnand %p1184_p12, %p1178_p7 }
 0x241   : > { %1188 = shalt.err (!%p1185_p13)
}
 0x242   : > { %s1233_s25 = smov 64   ;;  %s1234_s26 = smov 4  }
 0x243   : > { %1033 = dma.vmem_to_hbm [thread:$0]  (%p1526_p11), %s1468_s17, 1024, %s1466_s14, %s744_s15, %s1233_s25, %s1233_s25, %s1234_s26  }
 0x244 PF: > { %s772_s12 = sand.u32 1, %s1215_s18   ;;  %p1527_p8 = scmp.ne.s32.totalorder %s1524_s6, 0 }
 0x245   : > { %p1528_p10 = scmp.ge.s32.totalorder %s1227_s21, 2  ;;  %s773_s22 = scalar_lea.sflag [#allocation4], %s772_s12 }
 0x247   : > { %p1040_p0 = pnand %p1528_p10, %p1527_p8 }
 0x249   : > { %1210 = dma.done.wait (!%p1040_p0), %s773_s22, 1024  }
 0x24a   : > { %1212 = vsyncadd (!%p1040_p0), %s773_s22, 4294966272  ;;  %p18_p2 = scmp.ge.s32.totalorder %s1290_s24, 4   ;;  %s1529_s18 = smov %s1219_s19 }
 0x24b   : > { %s1530_s19 = smov %s1223_s20  ;;  %s1531_s20 = smov %s1302_s27 }
 0x24c   : > { %s1532_s21 = smov %s1290_s24  ;;  %20 = sbr.rel (!%p18_p2) target bundleno = 5 (0x5), region = 85 }
 0x253   :  { %778 = vsyncpa [#allocation3], 1 }
 0x254   :  { %780 = vsyncpa [#allocation3 + $0x1], 1 }
 0x255   :  { %781 = vsyncpa [#allocation4], 1 }
 0x256   :  { %783 = vsyncpa [#allocation4 + $0x1], 1 }

</bundles_post_ra>
